<compile_context>
chip_gen: v7x
topology: tpu7x:2x2x1
jax: 0.10.0
libtpu: 0.0.40
codegen_flags: <defaults>
</compile_context>

<pallas_src>
import jax
import jax.numpy as jnp
from jax.experimental import pallas as pl
from jax.experimental.pallas import tpu as pltpu


def _round_up(x, m):
    return ((x + m - 1) // m) * m


def mlp_kernel(x_ref, w1_ref, b1_ref, w2_ref, b2_ref, o_ref):
    # fc1: cast x tile to bf16 in-kernel (VALU has huge slack), MXU matmul
    # with f32 accumulation against the bf16-resident w1.
    xb = x_ref[...].astype(jnp.bfloat16)
    h = jnp.dot(xb, w1_ref[...], preferred_element_type=jnp.float32)
    # Bias + ReLU epilogue in f32 (portable to v5e's no-bf16 VPU).
    h = jnp.maximum(h + b1_ref[...], 0.0)
    # fc2: small f32 matmul into a lane-dense (tb, 128) zero-padded block.
    out = jnp.dot(h, w2_ref[...], preferred_element_type=jnp.float32)
    # Store bf16 -> halves the HBM writeback of the (mostly padding) output.
    o_ref[...] = (out + b2_ref[...]).astype(o_ref.dtype)


def net_forward(x_nchw, w1, b1, w2, b2, *, block_b=2048):
    """x_nchw: (B, 1, 28, 28) float32 -> logits (B, 10) float32.

    Weights stored as (in_features, out_features): y = x @ W + b
    (equivalent to PyTorch's x @ W.T + b with W of shape (out, in)).
    """
    B = x_nchw.shape[0]
    x = x_nchw.reshape(B, -1)                      # torch.flatten(x, 1)
    in_dim = x.shape[1]                            # 784
    hid = w1.shape[1]                              # 128
    out_dim = w2.shape[1]                          # 10

    # Small, one-time weight prep (few hundred KB total).
    w1b = w1.astype(jnp.bfloat16)
    b1_2d = b1.reshape(1, hid).astype(jnp.float32)

    # Pad fc2 to 128 output lanes: zero columns are free compute and keep the
    # output store unmasked / lane-dense.  (Correctness relies on the padding
    # of w2p/b2p being zero.)
    n_pad = _round_up(out_dim, 128)
    w2p = jnp.zeros((hid, n_pad), jnp.float32).at[:, :out_dim].set(
        w2.astype(jnp.float32))
    b2p = jnp.zeros((1, n_pad), jnp.float32).at[:, :out_dim].set(
        b2.astype(jnp.float32))

    # Batch tile: a multiple of 16 when tiling is needed; otherwise one block
    # covering the full (possibly ragged) batch.  No jnp.pad of x: a ragged
    # last block is masked by Pallas, which is safe (no cross-row reduction).
    block_b = _round_up(block_b, 16)
    tb = block_b if B > block_b else B
    grid = (pl.cdiv(B, tb),)

    out = pl.pallas_call(
        mlp_kernel,
        out_shape=jax.ShapeDtypeStruct((B, n_pad), jnp.bfloat16),
        grid_spec=pltpu.PrefetchScalarGridSpec(
            num_scalar_prefetch=0,
            grid=grid,
            in_specs=[
                pl.BlockSpec((tb, in_dim), lambda i: (i, 0)),   # x: streams per tile (f32)
                pl.BlockSpec((in_dim, hid), lambda i: (0, 0)),  # w1: VMEM-resident (bf16)
                pl.BlockSpec((1, hid), lambda i: (0, 0)),       # b1: VMEM-resident
                pl.BlockSpec((hid, n_pad), lambda i: (0, 0)),   # w2: VMEM-resident
                pl.BlockSpec((1, n_pad), lambda i: (0, 0)),     # b2: VMEM-resident
            ],
            out_specs=pl.BlockSpec((tb, n_pad), lambda i: (i, 0)),
        ),
        compiler_params=pltpu.CompilerParams(
            dimension_semantics=("parallel",),      # shards grid across v7x's 2 TCs
            vmem_limit_bytes=32 * 1024 * 1024,      # covers tb=2048 on v5e's 16 MiB default
        ),
    )(x, w1b, b1_2d, w2p, b2p)

    # Drop the zero-padded logit columns; cast logits back to f32.
    return out[:, :out_dim].astype(jnp.float32)


def init_params(key):
    """Deterministic init mimicking PyTorch Linear default (uniform +-1/sqrt(fan_in))."""
    k1, k2, k3, k4 = jax.random.split(key, 4)
    in_dim, hid, out_dim = 28 * 28, 128, 10
    bound1 = 1.0 / jnp.sqrt(in_dim)
    bound2 = 1.0 / jnp.sqrt(hid)
    # stored as (in_features, out_features)
    w1 = jax.random.uniform(k1, (in_dim, hid), jnp.float32, -bound1, bound1)
    b1 = jax.random.uniform(k2, (hid,), jnp.float32, -bound1, bound1)
    w2 = jax.random.uniform(k3, (hid, out_dim), jnp.float32, -bound2, bound2)
    b2 = jax.random.uniform(k4, (out_dim,), jnp.float32, -bound2, bound2)
    return w1, b1, w2, b2


if __name__ == "__main__":
    key = jax.random.PRNGKey(0)
    kx, kp = jax.random.split(key)

    # Small batch; input shape implied by the module: (B, 1, 28, 28)
    B = 8
    x = jax.random.normal(kx, (B, 1, 28, 28), jnp.float32)
    w1, b1, w2, b2 = init_params(kp)

    logits = net_forward(x, w1, b1, w2, b2)
    logits = jax.block_until_ready(logits)
    assert logits.shape == (B, 10)

    # Reference in plain JAX with the same bf16 rounding of x / w1 and of the
    # final output as the kernel.
    x_flat = x.reshape(B, -1)
    xb = x_flat.astype(jnp.bfloat16).astype(jnp.float32)
    w1b = w1.astype(jnp.bfloat16).astype(jnp.float32)
    ref = jnp.maximum(xb @ w1b + b1, 0.0) @ w2 + b2
    ref = ref.astype(jnp.bfloat16).astype(jnp.float32)
    assert jnp.allclose(logits, ref, atol=2e-3, rtol=2e-3), (
        float(jnp.max(jnp.abs(logits - ref))))

    print("KERNEL_OK")
</pallas_src>

<mosaic_0001>
module attributes {stable_mosaic.version = 11 : i64} {
  func.func @mlp_kernel(%arg0: i32, %arg1: memref<8x784xf32, #tpu.memory_space<vmem>>, %arg2: memref<784x128xbf16, #tpu.memory_space<vmem>>, %arg3: memref<1x128xf32, #tpu.memory_space<vmem>>, %arg4: memref<128x128xf32, #tpu.memory_space<vmem>>, %arg5: memref<1x128xf32, #tpu.memory_space<vmem>>, %arg6: memref<8x128xbf16, #tpu.memory_space<vmem>>) attributes {dimension_semantics = [#tpu.dimension_semantics<parallel>], iteration_bounds = array<i64: 1>, scalar_prefetch = 0 : i64, scratch_operands = 0 : i64, tpu.core_type = #tpu.core_type<tc>, window_params = [{transform_indices = @transform_0, window_bounds = array<i64: 8, 784>}, {pipeline_mode = #tpu.pipeline_mode<synchronous>, transform_indices = @transform_1, window_bounds = array<i64: 784, 128>}, {pipeline_mode = #tpu.pipeline_mode<synchronous>, transform_indices = @transform_2, window_bounds = array<i64: 1, 128>}, {pipeline_mode = #tpu.pipeline_mode<synchronous>, transform_indices = @transform_3, window_bounds = array<i64: 128, 128>}, {pipeline_mode = #tpu.pipeline_mode<synchronous>, transform_indices = @transform_4, window_bounds = array<i64: 1, 128>}, {transform_indices = @transform_5, window_bounds = array<i64: 8, 128>}]} {
    %c0 = arith.constant 0 : index
    %c0_0 = arith.constant 0 : index
    %0 = vector.load %arg1[%c0, %c0_0] : memref<8x784xf32, #tpu.memory_space<vmem>>, vector<8x784xf32>
    %1 = arith.truncf %0 : vector<8x784xf32> to vector<8x784xbf16>
    %c0_1 = arith.constant 0 : index
    %c0_2 = arith.constant 0 : index
    %2 = vector.load %arg2[%c0_1, %c0_2] : memref<784x128xbf16, #tpu.memory_space<vmem>>, vector<784x128xbf16>
    %cst = arith.constant dense<0.000000e+00> : vector<8x128xf32>
    %3 = tpu.matmul %1, %2, %cst {dimension_numbers = #tpu.dot_dimension_numbers<[1], [0], [0], [1], [0, 0, 1, 1], [], []>} : vector<8x784xbf16>, vector<784x128xbf16>, vector<8x128xf32> -> vector<8x128xf32>
    %c0_3 = arith.constant 0 : index
    %c0_4 = arith.constant 0 : index
    %4 = vector.load %arg3[%c0_3, %c0_4] : memref<1x128xf32, #tpu.memory_space<vmem>>, vector<1x128xf32>
    %5 = vector.broadcast %4 : vector<1x128xf32> to vector<8x128xf32>
    %6 = arith.addf %3, %5 : vector<8x128xf32>
    %cst_5 = arith.constant 0.000000e+00 : f32
    %7 = vector.broadcast %cst_5 : f32 to vector<8x128xf32>
    %8 = arith.maximumf %6, %7 : vector<8x128xf32>
    %c0_6 = arith.constant 0 : index
    %c0_7 = arith.constant 0 : index
    %9 = vector.load %arg4[%c0_6, %c0_7] : memref<128x128xf32, #tpu.memory_space<vmem>>, vector<128x128xf32>
    %cst_8 = arith.constant dense<0.000000e+00> : vector<8x128xf32>
    %10 = tpu.matmul %8, %9, %cst_8 {dimension_numbers = #tpu.dot_dimension_numbers<[1], [0], [0], [1], [0, 0, 1, 1], [], []>} : vector<8x128xf32>, vector<128x128xf32>, vector<8x128xf32> -> vector<8x128xf32>
    %c0_9 = arith.constant 0 : index
    %c0_10 = arith.constant 0 : index
    %11 = vector.load %arg5[%c0_9, %c0_10] : memref<1x128xf32, #tpu.memory_space<vmem>>, vector<1x128xf32>
    %12 = vector.broadcast %11 : vector<1x128xf32> to vector<8x128xf32>
    %13 = arith.addf %10, %12 : vector<8x128xf32>
    %14 = arith.truncf %13 : vector<8x128xf32> to vector<8x128xbf16>
    %c0_11 = arith.constant 0 : index
    %c0_12 = arith.constant 0 : index
    %15 = vector.load %arg6[%c0_11, %c0_12] : memref<8x128xbf16, #tpu.memory_space<vmem>>, vector<8x128xbf16>
    tpu.vector_store %arg6[%c0_11, %c0_12], %14 {strides = array<i32>} : memref<8x128xbf16, #tpu.memory_space<vmem>>, vector<8x128xbf16>,
    return
  }
  func.func @transform_0(%arg0: i32) -> (i32, i32) {
    %c0_i32 = arith.constant 0 : i32
    %c0_i32_0 = arith.constant 0 : i32
    return %arg0, %c0_i32 : i32, i32
  }
  func.func @transform_1(%arg0: i32) -> (i32, i32) {
    %c0_i32 = arith.constant 0 : i32
    %c0_i32_0 = arith.constant 0 : i32
    %c0_i32_1 = arith.constant 0 : i32
    return %c0_i32, %c0_i32_0 : i32, i32
  }
  func.func @transform_2(%arg0: i32) -> (i32, i32) {
    %c0_i32 = arith.constant 0 : i32
    %c0_i32_0 = arith.constant 0 : i32
    %c0_i32_1 = arith.constant 0 : i32
    return %c0_i32, %c0_i32_0 : i32, i32
  }
  func.func @transform_3(%arg0: i32) -> (i32, i32) {
    %c0_i32 = arith.constant 0 : i32
    %c0_i32_0 = arith.constant 0 : i32
    %c0_i32_1 = arith.constant 0 : i32
    return %c0_i32, %c0_i32_0 : i32, i32
  }
  func.func @transform_4(%arg0: i32) -> (i32, i32) {
    %c0_i32 = arith.constant 0 : i32
    %c0_i32_0 = arith.constant 0 : i32
    %c0_i32_1 = arith.constant 0 : i32
    return %c0_i32, %c0_i32_0 : i32, i32
  }
  func.func @transform_5(%arg0: i32) -> (i32, i32) {
    %c0_i32 = arith.constant 0 : i32
    %c0_i32_0 = arith.constant 0 : i32
    return %arg0, %c0_i32 : i32, i32
  }
}

</mosaic_0001>

<bundles_post_ra>
// kernel: tpu_custom_call.1
= control target key start
LH: loop header
LB: loop body
LE: loop exit
PB: predicated region body
PF: predicated region fallthrough
CT: control target
= control target key end

     0   :  { %10 = vsyncpa [#allocation3], 0  ;;  %s1203_s0 = inlined_call_operand.hbm [shape: f32[8,784], index: 0, kind: input, shape index: {}]   ;;  %s1204_s1 = inlined_call_operand.hbm [shape: bf16[784,128], index: 1, kind: input, shape index: {}]   ;;  %s1205_s2 = inlined_call_operand.vmem [shape: f32[1,128], index: 2, kind: input, shape index: {}]   ;;  %s1206_s3 = inlined_call_operand.hbm [shape: f32[128,128], index: 3, kind: input, shape index: {}]   ;;  %s1207_s4 = inlined_call_operand.vmem [shape: f32[1,128], index: 4, kind: input, shape index: {}]   ;;  %s1208_s5 = inlined_call_operand.hbm [shape: bf16[8,128], index: 5, kind: output, shape index: {}]  }
   0x1   :  { %11 = vsyncpa [#allocation6], 0 }
   0x2   :  { %12 = vsyncpa [#allocation4], 0  ;;  %s1106_s18 = smov [#allocation5]   ;;  %s1012_s22 = scalar_lea.hbm %s1204_s1, 6272 }
   0x3   :  { %s28_s19 = sshll.u32 %s1106_s18, 4  ;;  %p1013_p0 = scmp.ne.s32.totalorder %s1204_s1, %s1012_s22  ;;  %s29_s19 = int_to_ptr.vmem [resolvable:$true] %s28_s19 }
   0x4   :  { %p1016_p1 = scmp.lt.u32.totalorder %s1012_s22, %s1204_s1 }
   0x6   :  { %p1018_p2 = pnand %p1016_p1, %p1013_p0 }
   0x8   :  { %1021 = shalt.err (!%p1018_p2)
}
   0x9   :  { %s1022_s27 = scalar_lea.vmem %s29_s19, 6272  ;;  %p1027_p4 = scmp.lt.s32.totalorder %s29_s19, %s29_s19 }
   0xa   :  { %p1023_p3 = scmp.ne.s32.totalorder %s29_s19, %s1022_s27  ;;  %p1028_p5 = scmp.lt.s32.totalorder %s1022_s27, %s1022_s27 }
   0xc   :  { %p1029_p6 = por %p1028_p5, %p1027_p4 }
   0xe   :  { %p1030_p7 = pnand %p1029_p6, %p1023_p3 }
  0x10   :  { %1033 = shalt.err (!%p1030_p7)
}
  0x11   :  { %s1107_s28 = smov 64   ;;  %s1108_s29 = smov 4  }
  0x12   :  { %34 = dma.hbm_to_vmem [thread:$0]  %s1204_s1, 6272, %s29_s19, [#allocation6], %s1107_s28, %s1107_s28, %s1108_s29  }
  0x13   :  { %s1109_s7 = smov [#allocation2]   ;;  %s1110_s9 = smov [#allocation7]  }
  0x14   :  { %s19_s8 = sshll.u32 %s1109_s7, 4  ;;  %s42_s10 = sshll.u32 %s1110_s9, 4  ;;  %s20_s8 = int_to_ptr.vmem [resolvable:$true] %s19_s8  ;;  %s43_s10 = int_to_ptr.vmem [resolvable:$true] %s42_s10 }
  0x15   :  { %s1034_s13 = scalar_lea.hbm %s1203_s0, 896 }
  0x16   :  { %p1035_p8 = scmp.ne.s32.totalorder %s1203_s0, %s1034_s13  ;;  %p1038_p9 = scmp.lt.u32.totalorder %s1034_s13, %s1203_s0 }
  0x18   :  { %p1040_p10 = pnand %p1038_p9, %p1035_p8 }
  0x1a   :  { %1043 = shalt.err (!%p1040_p10)
}
  0x1b   :  { %s1044_s1 = scalar_lea.vmem %s20_s8, 896  ;;  %p1049_p12 = scmp.lt.s32.totalorder %s20_s8, %s20_s8 }
  0x1c   :  { %p1045_p11 = scmp.ne.s32.totalorder %s20_s8, %s1044_s1  ;;  %p1050_p13 = scmp.lt.s32.totalorder %s1044_s1, %s1044_s1 }
  0x1e   :  { %p1051_p0 = por %p1050_p13, %p1049_p12 }
  0x20   :  { %p1052_p1 = pnand %p1051_p0, %p1045_p11 }
  0x22   :  { %1055 = shalt.err (!%p1052_p1)
}
  0x23   :  { %22 = dma.hbm_to_vmem [thread:$0]  %s1203_s0, 896, %s20_s8, [#allocation3]  }
  0x24   :  { %s1056_s22 = scalar_lea.hbm %s1206_s3, 2048 }
  0x25   :  { %p1057_p2 = scmp.ne.s32.totalorder %s1206_s3, %s1056_s22  ;;  %p1060_p3 = scmp.lt.u32.totalorder %s1056_s22, %s1206_s3 }
  0x27   :  { %p1062_p4 = pnand %p1060_p3, %p1057_p2 }
  0x29   :  { %1065 = shalt.err (!%p1062_p4)
}
  0x2a   :  { %s1066_s27 = scalar_lea.vmem %s43_s10, 2048  ;;  %p1071_p6 = scmp.lt.s32.totalorder %s43_s10, %s43_s10 }
  0x2b   :  { %p1067_p5 = scmp.ne.s32.totalorder %s43_s10, %s1066_s27  ;;  %p1072_p7 = scmp.lt.s32.totalorder %s1066_s27, %s1066_s27 }
  0x2d   :  { %p1073_p8 = por %p1072_p7, %p1071_p6 }
  0x2f   :  { %p1074_p9 = pnand %p1073_p8, %p1067_p5 }
  0x31   :  { %1077 = shalt.err (!%p1074_p9)
}
  0x32   :  { %s1111_s0 = smov 128   ;;  %s1112_s28 = smov 8  }
  0x33   :  { %48 = dma.hbm_to_vmem [thread:$0]  %s1206_s3, 2048, %s43_s10, [#allocation6], %s1111_s0, %s1111_s0, %s1112_s28  }
  0x34   :  { %1100 = dma.done.wait [#allocation3], 896  }
  0x35   :  { %1101 = vsyncadd [#allocation3], 4294966400 }
  0x36   :  { %1102 = dma.done.wait [#allocation6], 8320  }
  0x37   :  { %1103 = vsyncadd [#allocation6], 4294958976  ;;  %v963_v0 = vld [vmem:[#allocation5 + $0x40] sm:$0xff]   ;;  %v967_v4 = vld [vmem:[#allocation5 + $0x48] sm:$0xff]   ;;  %v1113_v44 = vmov 0.0   ;;  %vm1114_vm0 = vmmov 0  }
  0x38   :  { %v964_v1 = vld [vmem:[#allocation5] sm:$0xff]   ;;  %802 = vmatprep.subr.bf16.mxu0 %v963_v0  ;;  %v968_v5 = vld [vmem:[#allocation5 + $0x8] sm:$0xff]   ;;  %v971_v8 = vld [vmem:[#allocation5 + $0x50] sm:$0xff]   ;;  %vm474_vm1 = vcmask 130048   ;;  %s1116_s8 = smov [#allocation8]  }
  0x39   :  { %v965_v2 = vld [vmem:[#allocation5 + $0xc0] sm:$0xff]   ;;  %803 = vmatpush3.bf16.msra.mxu0 %v964_v1  ;;  %v969_v6 = vld [vmem:[#allocation5 + $0xc8] sm:$0xff]   ;;  %v972_v9 = vld [vmem:[#allocation5 + $0x10] sm:$0xff]   ;;  %s740_s9 = sshll.u32 %s1116_s8, 4  ;;  %s741_s9 = int_to_ptr.vmem [resolvable:$true] %s740_s9 }
  0x3a   :  { %v966_v3 = vld [vmem:[#allocation5 + $0x80] sm:$0xff]   ;;  %824 = vmatprep.subr.bf16.mxu1 %v965_v2  ;;  %804 = vmatprep.subr.bf16.mxu0 %v967_v4  ;;  %v970_v7 = vld [vmem:[#allocation5 + $0x88] sm:$0xff]   ;;  %v973_v10 = vld [vmem:[#allocation5 + $0xd0] sm:$0xff]   ;;  %s1078_s10 = scalar_lea.vmem %s741_s9, 64  ;;  %p1083_p11 = scmp.lt.s32.totalorder %s741_s9, %s741_s9 }
  0x3b   :  { %825 = vmatpush3.bf16.msra.mxu1 %v966_v3  ;;  %v974_v11 = vld [vmem:[#allocation5 + $0x90] sm:$0xff]   ;;  %v975_v12 = vld [vmem:[#allocation5 + $0x58] sm:$0xff]   ;;  %v979_v16 = vld [vmem:[#allocation5 + $0x60] sm:$0xff]   ;;  %v1115_v3 = vmov 0.0|0.0   ;;  %p1079_p10 = scmp.ne.s32.totalorder %s741_s9, %s1078_s10  ;;  %p1084_p12 = scmp.lt.s32.totalorder %s1078_s10, %s1078_s10 }
  0x3c   :  { %826 = vmatprep.subr.bf16.mxu1 %v969_v6  ;;  %v976_v13 = vld [vmem:[#allocation5 + $0x18] sm:$0xff]   ;;  %v980_v17 = vld [vmem:[#allocation5 + $0x20] sm:$0xff]   ;;  %v983_v20 = vld [vmem:[#allocation5 + $0x68] sm:$0xff]  }
  0x3d   :  { %805 = vmatpush3.bf16.msra.mxu0 %v968_v5  ;;  %v977_v14 = vld [vmem:[#allocation5 + $0xd8] sm:$0xff]   ;;  %v981_v18 = vld [vmem:[#allocation5 + $0xe0] sm:$0xff]   ;;  %v984_v21 = vld [vmem:[#allocation5 + $0x28] sm:$0xff]   ;;  %p1085_p13 = por %p1084_p12, %p1083_p11 }
  0x3e   :  { %806 = vmatprep.subr.bf16.mxu0 %v971_v8  ;;  %v978_v15 = vld [vmem:[#allocation5 + $0x98] sm:$0xff]   ;;  %v982_v19 = vld [vmem:[#allocation5 + $0xa0] sm:$0xff]   ;;  %v985_v22 = vld [vmem:[#allocation5 + $0xe8] sm:$0xff]  }
  0x3f   :  { %827 = vmatpush3.bf16.msra.mxu1 %v970_v7  ;;  %v986_v23 = vld [vmem:[#allocation5 + $0xa8] sm:$0xff]   ;;  %v987_v24 = vld [vmem:[#allocation5 + $0x70] sm:$0xff]   ;;  %v991_v28 = vld [vmem:[#allocation5 + $0x78] sm:$0xff]   ;;  %p1086_p0 = pnand %p1085_p13, %p1079_p10 }
  0x40   :  { %828 = vmatprep.subr.bf16.mxu1 %v973_v10  ;;  %v988_v25 = vld [vmem:[#allocation5 + $0x30] sm:$0xff]   ;;  %v992_v29 = vld [vmem:[#allocation5 + $0x38] sm:$0xff]   ;;  %v61_v34 = vld [vmem:[#allocation2] sm:$0xff] }
  0x41   :  { %807 = vmatpush3.bf16.msra.mxu0 %v972_v9  ;;  %v989_v26 = vld [vmem:[#allocation5 + $0xf0] sm:$0xff]   ;;  %v993_v30 = vld [vmem:[#allocation5 + $0xf8] sm:$0xff]   ;;  %v68_v35 = vpack.c.bf16 %v61_v34, %v61_v34  ;;  %v995_v36 = vld [vmem:[#allocation5 + $0x140] sm:$0xff]  }
  0x42   :  { %808 = vmatprep.subr.bf16.mxu0 %v975_v12  ;;  %v990_v27 = vld [vmem:[#allocation5 + $0xb0] sm:$0xff]   ;;  %v994_v33 = vld [vmem:[#allocation5 + $0xb8] sm:$0xff]   ;;  %v64_v37 = vld [vmem:[#allocation2 + $0x18] sm:$0xff] }
  0x43   :  { %829 = vmatpush3.bf16.msra.mxu1 %v974_v11  ;;  %v62_v31 = vld [vmem:[#allocation2 + $0x8] sm:$0xff]  ;;  %v71_v38 = vpack.c.bf16 %v64_v37, %v64_v37  ;;  %v996_v39 = vld [vmem:[#allocation5 + $0x100] sm:$0xff]   ;;  %v63_v40 = vld [vmem:[#allocation2 + $0x10] sm:$0xff] }
  0x44   :  { %830 = vmatprep.subr.bf16.mxu1 %v977_v14  ;;  %v69_v32 = vpack.c.bf16 %v62_v31, %v62_v31  ;;  %v70_v41 = vpack.c.bf16 %v63_v40, %v63_v40  ;;  %v997_v42 = vld [vmem:[#allocation5 + $0x148] sm:$0xff]   ;;  %v999_v45 = vld [vmem:[#allocation5 + $0x150] sm:$0xff]   ;;  %v1001_v47 = vld [vmem:[#allocation5 + $0x158] sm:$0xff]  }
  0x45   :  { %809 = vmatpush3.bf16.msra.mxu0 %v976_v13  ;;  %550 = vmatprep.mubr.bf16.mxu1 %v71_v38  ;;  %v998_v43 = vld [vmem:[#allocation5 + $0x108] sm:$0xff]   ;;  %v1000_v46 = vld [vmem:[#allocation5 + $0x110] sm:$0xff]   ;;  %v1002_v48 = vld [vmem:[#allocation5 + $0x118] sm:$0xff]  }
  0x46   :  { %810 = vmatprep.subr.bf16.mxu0 %v979_v16  ;;  %510 = vmatprep.mubr.bf16.mxu0 %v69_v32  ;;  %v1003_v49 = vld [vmem:[#allocation5 + $0x160] sm:$0xff]   ;;  %v1005_v51 = vld [vmem:[#allocation5 + $0x168] sm:$0xff]   ;;  %v66_v53 = vld [vmem:[#allocation2 + $0x28] sm:$0xff] }
  0x47   :  { %831 = vmatpush3.bf16.msra.mxu1 %v978_v15  ;;  %v1004_v50 = vld [vmem:[#allocation5 + $0x120] sm:$0xff]   ;;  %v73_v54 = vpack.c.bf16 %v66_v53, %v66_v53  ;;  %v67_v55 = vld [vmem:[#allocation2 + $0x30] sm:$0xff]  ;;  %v1006_v56 = vld [vmem:[#allocation5 + $0x128] sm:$0xff]  }
  0x48   :  { %832 = vmatprep.subr.bf16.mxu1 %v981_v18  ;;  %v1011_v52 = vld [vmem:[#allocation5 + $0x180] sm:$0xff]   ;;  %v74_v57 = vpack.c.bf16 %v67_v55, %v67_v55  ;;  %v1007_v58 = vld [vmem:[#allocation5 + $0x170] sm:$0xff]   ;;  %v1009_v60 = vld [vmem:[#allocation5 + $0x178] sm:$0xff]  }
  0x49   :  { %811 = vmatpush3.bf16.msra.mxu0 %v980_v17  ;;  %v1008_v59 = vld [vmem:[#allocation5 + $0x130] sm:$0xff]   ;;  %v1010_v61 = vld [vmem:[#allocation5 + $0x138] sm:$0xff]   ;;  %v65_v62 = vld [vmem:[#allocation2 + $0x20] sm:$0xff] }
  0x4a   :  { %812 = vmatprep.subr.bf16.mxu0 %v983_v20  ;;  %v72_v63 = vpack.c.bf16 %v65_v62, %v65_v62  ;;  %v639_v0 = vld [vmem:[#allocation7] sm:$0xff]  ;;  %v640_v1 = vld [vmem:[#allocation7 + $0x8] sm:$0xff]  ;;  %v641_v2 = vld [vmem:[#allocation7 + $0x10] sm:$0xff] }
  0x4b   :  { %833 = vmatpush3.bf16.msra.mxu1 %v982_v19  ;;  %v929_v4 = vpack.c.bf16 %v640_v1, %v639_v0  ;;  %v642_v5 = vld [vmem:[#allocation7 + $0x18] sm:$0xff]  ;;  %v643_v7 = vld [vmem:[#allocation7 + $0x20] sm:$0xff]  ;;  %v644_v8 = vld [vmem:[#allocation7 + $0x28] sm:$0xff] }
  0x4c   :  { %834 = vmatprep.subr.bf16.mxu1 %v985_v22  ;;  %v932_v6 = vpack.c.bf16 %v642_v5, %v641_v2  ;;  %v935_v9 = vpack.c.bf16 %v644_v8, %v643_v7  ;;  %v645_v10 = vld [vmem:[#allocation7 + $0x30] sm:$0xff]  ;;  %v646_v11 = vld [vmem:[#allocation7 + $0x38] sm:$0xff]  ;;  %v647_v13 = vld [vmem:[#allocation7 + $0x40] sm:$0xff] }
  0x4d   :  { %813 = vmatpush3.bf16.msra.mxu0 %v984_v21  ;;  %v938_v12 = vpack.c.bf16 %v646_v11, %v645_v10  ;;  %v648_v14 = vld [vmem:[#allocation7 + $0x48] sm:$0xff]  ;;  %v649_v16 = vld [vmem:[#allocation7 + $0x50] sm:$0xff]  ;;  %v650_v17 = vld [vmem:[#allocation7 + $0x58] sm:$0xff] }
  0x4e   :  { %814 = vmatprep.subr.bf16.mxu0 %v987_v24  ;;  %v941_v15 = vpack.c.bf16 %v648_v14, %v647_v13  ;;  %v944_v18 = vpack.c.bf16 %v650_v17, %v649_v16  ;;  %v651_v19 = vld [vmem:[#allocation7 + $0x60] sm:$0xff]  ;;  %v652_v20 = vld [vmem:[#allocation7 + $0x68] sm:$0xff]  ;;  %v653_v22 = vld [vmem:[#allocation7 + $0x70] sm:$0xff] }
  0x4f   :  { %835 = vmatpush3.bf16.msra.mxu1 %v986_v23  ;;  %v947_v21 = vpack.c.bf16 %v652_v20, %v651_v19  ;;  %v654_v23 = vld [vmem:[#allocation7 + $0x78] sm:$0xff] }
  0x50   :  { %836 = vmatprep.subr.bf16.mxu1 %v989_v26  ;;  %v950_v24 = vpack.c.bf16 %v654_v23, %v653_v22  ;;  %v750_v26 = vld [vmem:[%s1205_s2] ss:$0 sm:$0xff] }
  0x51   :  { %815 = vmatpush3.bf16.msra.mxu0 %v988_v25 }
  0x52   :  { %816 = vmatprep.subr.bf16.mxu0 %v991_v28 }
  0x53   :  { %837 = vmatpush3.bf16.msra.mxu1 %v990_v27 }
  0x54   :  { %838 = vmatprep.subr.bf16.mxu1 %v993_v30 }
  0x55   :  { %817 = vmatpush3.bf16.msra.mxu0 %v992_v29 }
  0x56   :  { %846 = vmatprep.subr.bf16.mxu0 %v995_v36 }
  0x57   :  { %839 = vmatpush3.bf16.msra.mxu1 %v994_v33 }
  0x58   :  { %511 = vmatmul.mubr.bf16.vlgmr.msra.gmra.mrb[0].mxu0 %v68_v35  ;;  %887 = vmatprep.subr.bf16.mxu1 %v1113_v44 }
  0x59   :  { %847 = vmatpush3.bf16.msra.mxu0 %v996_v39  ;;  %590 = vmatprep.mubr.bf16.mxu0 %v73_v54 }
  0x5a   :  { %551 = vmatmul.mubr.bf16.vlgmr.msra.gmra.mrb[0].mxu1 %v70_v41  ;;  %848 = vmatprep.subr.bf16.mxu0 %v997_v42 }
  0x5b   :  { %889 = vmatprep.mubr.msk.bf16.mxu1 %vm1114_vm0, %v1113_v44  ;;  %888 = vmatpush3.bf16.msra.mxu1 %v1011_v52 }
  0x5c   :  { %928 = vmatprep.subr.bf16.mxu1 %v1115_v3 }
  0x5d   :  { %849 = vmatpush3.bf16.msra.mxu0 %v998_v43 }
  0x5e   :  { %850 = vmatprep.subr.bf16.mxu0 %v999_v45 }
  0x61   :  { %851 = vmatpush3.bf16.msra.mxu0 %v1000_v46 }
  0x62   :  { %852 = vmatprep.subr.bf16.mxu0 %v1001_v47  ;;  %890 = vmatmul.mubr.msk.bf16.vlgmr.msra.gmra.mrb[4].mxu1 %vm474_vm1, %v74_v57 }
  0x63   :  { %925 = vmatprep.mubr.msk.f32.mxu1 %vm1114_vm0, %v1113_v44  ;;  %930 = vmatpush3.bf16.msra.mxu1 %v929_v4 }
  0x64   :  { %931 = vmatprep.subr.bf16.mxu1 %v1115_v3 }
  0x65   :  { %853 = vmatpush3.bf16.msra.mxu0 %v1002_v48 }
  0x66   :  { %854 = vmatprep.subr.bf16.mxu0 %v1003_v49 }
  0x67   :  { %933 = vmatpush3.bf16.msra.mxu1 %v932_v6 }
  0x68   :  { %934 = vmatprep.subr.bf16.mxu1 %v1115_v3 }
  0x69   :  { %855 = vmatpush3.bf16.msra.mxu0 %v1004_v50  ;;  %v801_v50 = vld [vmem:[%s1207_s4] ss:$0 sm:$0xff] }
  0x6a   :  { %856 = vmatprep.subr.bf16.mxu0 %v1005_v51 }
  0x6b   :  { %936 = vmatpush3.bf16.msra.mxu1 %v935_v9 }
  0x6c   :  { %937 = vmatprep.subr.bf16.mxu1 %v1115_v3 }
  0x6d   :  { %857 = vmatpush3.bf16.msra.mxu0 %v1006_v56 }
  0x6e   :  { %858 = vmatprep.subr.bf16.mxu0 %v1007_v58 }
  0x6f   :  { %939 = vmatpush3.bf16.msra.mxu1 %v938_v12 }
  0x70   :  { %940 = vmatprep.subr.bf16.mxu1 %v1115_v3 }
  0x71   :  { %859 = vmatpush3.bf16.msra.mxu0 %v1008_v59 }
  0x72   :  { %860 = vmatprep.subr.bf16.mxu0 %v1009_v60 }
  0x73   :  { %942 = vmatpush3.bf16.msra.mxu1 %v941_v15 }
  0x74   :  { %943 = vmatprep.subr.bf16.mxu1 %v1115_v3 }
  0x75   :  { %861 = vmatpush3.bf16.msra.mxu0 %v1010_v61 }
  0x77   :  { %945 = vmatpush3.bf16.msra.mxu1 %v944_v18 }
  0x78   :  { %591 = vmatmul.mubr.bf16.vlgmr.msra.gmra.mrb[4].mxu0 %v72_v63  ;;  %946 = vmatprep.subr.bf16.mxu1 %v1115_v3 }
  0x7b   :  { %948 = vmatpush3.bf16.msra.mxu1 %v947_v21 }
  0x7c   :  { %949 = vmatprep.subr.bf16.mxu1 %v1115_v3 }
  0x7f   :  { %951 = vmatpush3.bf16.msra.mxu1 %v950_v24 }
 0x12b   :  { %v818_v25 = vpop.f32.mrb[0].mxu0 }
 0x12c   :  { %v819_v27 = vpop.f32.mrb[1].mxu0 }
 0x12d   :  { %v820_v28 = vadd.f32 %v819_v27, %v818_v25  ;;  %v821_v29 = vpop.f32.mrb[2].mxu0  ;;  %v840_v30 = vpop.f32.mrb[0].mxu1 }
 0x12e   :  { %v822_v31 = vpop.f32.mrb[3].mxu0  ;;  %v841_v33 = vpop.f32.mrb[1].mxu1 }
 0x12f   :  { %v513_v32 = vadd.f32 %v820_v28, %v750_v26  ;;  %v842_v34 = vadd.f32 %v841_v33, %v840_v30  ;;  %v843_v35 = vpop.f32.mrb[2].mxu1 }
 0x130   :  { %v844_v36 = vpop.f32.mrb[3].mxu1 }
 0x131   :  { %v553_v37 = vadd.f32 %v842_v34, %v513_v32 }
 0x135   :  { %v632_v38 = vpop.f32.mrb[4].mxu1 }
 0x136   :  { %v891_v39 = vpop.f32.mrb[5].mxu1 }
 0x137   :  { %v635_v40 = vpop.f32.mrb[6].mxu1 }
 0x138   :  { %v892_v41 = vpop.f32.mrb[7].mxu1 }
 0x14b   :  { %v862_v42 = vpop.f32.mrb[4].mxu0 }
 0x14c   :  { %v863_v43 = vpop.f32.mrb[5].mxu0 }
 0x14d   :  { %v864_v44 = vadd.f32 %v863_v43, %v862_v42  ;;  %v865_v45 = vpop.f32.mrb[6].mxu0 }
 0x14e   :  { %v866_v46 = vpop.f32.mrb[7].mxu0 }
 0x14f   :  { %v593_v47 = vadd.f32 %v864_v44, %v553_v37 }
 0x151   :  { %v633_v48 = vadd.f32 %v632_v38, %v593_v47 }
 0x153   :  { %v638_v49 = vmax.f32 %v633_v48, 0.0 }
 0x155   :  { %926 = vmatmul.mubr.f32.vlgmr.msra.gmra.mrb[8].mxu1 %v638_v49 }
 0x228   :  { %v728_v51 = vpop.f32.mrb[8].mxu1 }
 0x229   :  { %v729_v52 = vadd.f32 %v801_v50, %v728_v51  ;;  %v927_v53 = vpop.f32.mrb[9].mxu1 }
 0x22b   :  { %v732_v54 = vpack.c.bf16 %v729_v52, %v729_v52 }
 0x22d   :  { %733 = vst [vmem:[#allocation8] sm:$0xf] %v732_v54 }
 0x22e   :  { %1089 = shalt.err (!%p1086_p0)
}
 0x22f   :  { %s1090_s13 = scalar_lea.hbm %s1208_s5, 64 }
 0x230   :  { %p1091_p1 = scmp.ne.s32.totalorder %s1208_s5, %s1090_s13  ;;  %p1094_p2 = scmp.lt.u32.totalorder %s1090_s13, %s1208_s5 }
 0x232   :  { %p1096_p3 = pnand %p1094_p2, %p1091_p1 }
 0x234   :  { %1099 = shalt.err (!%p1096_p3)
}
 0x235   :  { %743 = dma.vmem_to_hbm [thread:$0]  %s741_s9, 64, %s1208_s5, [#allocation4]  }
 0x236   :  { %1104 = dma.done.wait [#allocation4], 64  }
 0x237   :  { %1105 = vsyncadd [#allocation4], 4294967232 }
 0x238   :  { %747 = vsyncpa [#allocation3], 1 }
 0x239   :  { %748 = vsyncpa [#allocation6], 1 }
 0x23a   :  { %749 = vsyncpa [#allocation4], 1 }

</bundles_post_ra>
